<compile_context>
chip_gen: v7x
topology: tpu7x:2x2x1
jax: 0.10.0
libtpu: 0.0.40
codegen_flags: <defaults>
</compile_context>

<pallas_src>
import jax
import jax.numpy as jnp
from jax.experimental import pallas as pl
from jax.experimental.pallas import tpu as pltpu


def _disc_kernel(x_ref, w1_ref, b1_ref, w2_ref, b2_ref, o_ref):
    # Layer 1: [tb, D] @ [D, H] on the MXU with f32 accumulation.
    h = jnp.dot(x_ref[...], w1_ref[...], preferred_element_type=jnp.float32)
    h = jnp.maximum(h + b1_ref[...], 0.0)                      # bias [1, H] + ReLU

    # TODO(synk): nn.Dropout(0.4) is identity in eval mode; training-mode dropout
    # would need pltpu.prng_seed + pltpu.stateful_bernoulli with 1/(1-p) scaling.

    # Layer 2 (H -> 1), produced directly as a lane-dense [1, tb] row:
    # contract the replicated w2 rows [8, H] with h [tb, H] over H (trans-B
    # dot_general); row 0 holds sum_k h[j, k] * w2[k] for every batch row j.
    z = jax.lax.dot_general(
        w2_ref[...], h, (((1,), (1,)), ((), ())),
        preferred_element_type=jnp.float32)[0:1, :]             # [1, tb]
    z = z + b2_ref[0, 0]
    # sigmoid(z) = 1 / (1 + exp(-z)); reciprocal on the EUP (approx) slot.
    o_ref[...] = pl.reciprocal(1.0 + jnp.exp(-z), approx=True)


def _round_up(v, m):
    return ((v + m - 1) // m) * m


def _pick_batch_tile(B, tb_max=1024, min_steps=2):
    """Full batch for small B; otherwise a lane-aligned (multiple-of-128) tile giving
    at least `min_steps` grid steps (keeps v7x's second TensorCore busy)."""
    if B <= 128:
        return B
    tb = _round_up(-(-B // min_steps), 128)                     # cdiv, then 128-align
    return min(tb, max(128, (tb_max // 128) * 128))


def _vmem_bytes_needed(tb, D, H, x_itemsize):
    """Rough upper bound on scoped VMEM use (double-buffered everything)."""
    x_buf = 2 * tb * max(_round_up(D, 128), 128) * x_itemsize   # pipelined x stream
    w1_buf = 2 * _round_up(D, 8) * _round_up(H, 128) * x_itemsize
    small = 2 * (2 * 8 * _round_up(H, 128) + 8 * _round_up(tb, 128)) * 4
    return x_buf + w1_buf + small


def discriminator_forward(x, w1, b1, w2, b2, *, tb=None, compute_dtype=jnp.bfloat16):
    """x: [B, D] -> [B, 1] probabilities.  w1: [D, H], b1: [1, H], w2: [H, 1], b2: [1, 1]."""
    B, D = x.shape
    H = w1.shape[1]
    assert w1.shape == (D, H) and b1.shape == (1, H)
    assert w2.shape == (H, 1) and b2.shape == (1, 1)

    # Batch tile: when splitting, tb must be a multiple of 128 so the lane-dense
    # (1, tb) output block (and the (tb, D) x block) stay legal BlockSpecs;
    # a single full-batch block is always legal.
    if tb is None:
        tb = _pick_batch_tile(B)
    else:
        tb = max(1, min(int(tb), B))
        if tb < B:
            tb = max(128, (tb // 128) * 128)
            if tb >= B:
                tb = B
    n_blocks = pl.cdiv(B, tb)      # ragged last tile handled by the grid (no pad copy)
    bp = n_blocks * tb

    # Matmul inputs in compute_dtype (bf16 halves the dominant HBM stream and raises
    # MXU rate); accumulation, bias, layer 2 and sigmoid stay f32.
    xc = x if x.dtype == compute_dtype else x.astype(compute_dtype)
    w1c = w1 if w1.dtype == compute_dtype else w1.astype(compute_dtype)
    b1f = b1.astype(jnp.float32)
    w2_rows = jnp.broadcast_to(w2.reshape(1, H).astype(jnp.float32), (8, H))
    b2f = b2.astype(jnp.float32)
    isz = jnp.dtype(compute_dtype).itemsize

    cost = pl.CostEstimate(
        flops=2 * bp * D * H + 2 * bp * H * 8,
        transcendentals=2 * bp,                                 # exp + reciprocal per row
        bytes_accessed=(B * D + D * H) * isz + (9 * H + 1) * 4 + bp * 4,
    )

    # Explicit scoped-VMEM limit only when large tiles could exceed the default scope
    # (matters most on v5e's 16 MiB default); never needed for small problems.
    params = dict(dimension_semantics=("parallel",))            # megacore over batch tiles
    need = _vmem_bytes_needed(tb, D, H, isz)
    if need > (12 << 20):
        params["vmem_limit_bytes"] = min(int(need * 1.25) + (4 << 20), 112 << 20)
    compiler_params = pltpu.CompilerParams(**params)

    # TODO(synk): for very large D (W1 approaching VMEM capacity, esp. v7x's 64 MiB),
    # add a K grid axis ("arbitrary") with a VMEM f32 accumulator and stream W1 in
    # (tk, H) blocks instead of holding it resident.

    def _run(single_buffer_weights):
        # W1 / b1 / w2 have constant index maps: single-buffer them to halve their
        # VMEM footprint (double buffering buys nothing for resident operands).
        res = dict(pipeline_mode=pl.Buffered(1)) if single_buffer_weights else {}
        grid_spec = pltpu.PrefetchScalarGridSpec(
            num_scalar_prefetch=0,
            grid=(n_blocks,),
            in_specs=[
                pl.BlockSpec((tb, D), lambda i: (i, 0)),               # x tile (pipelined)
                pl.BlockSpec((D, H), lambda i: (0, 0), **res),         # W1 (resident)
                pl.BlockSpec((1, H), lambda i: (0, 0), **res),         # b1 (resident)
                pl.BlockSpec((8, H), lambda i: (0, 0), **res),         # w2 rows (resident)
                pl.BlockSpec(memory_space=pltpu.MemorySpace.SMEM),     # b2 scalar
            ],
            out_specs=pl.BlockSpec((1, tb), lambda i: (0, i)),         # lane-dense row
        )
        return pl.pallas_call(
            _disc_kernel,
            out_shape=jax.ShapeDtypeStruct((1, bp), jnp.float32),
            grid_spec=grid_spec,
            compiler_params=compiler_params,
            cost_estimate=cost,
        )(xc, w1c, b1f, w2_rows, b2f)

    try:
        out_row = _run(single_buffer_weights=True)
    except Exception:
        # Fallback if this jax/Mosaic version rejects pipeline_mode=pl.Buffered(1).
        out_row = _run(single_buffer_weights=False)

    return out_row.reshape(-1)[:B].reshape(B, 1)


def init_params(key, f_dim):
    """Deterministic PyTorch-style uniform(-1/sqrt(fan_in), 1/sqrt(fan_in)) init."""
    dim = 2 * f_dim
    k1, k2, k3, k4 = jax.random.split(key, 4)
    bound1 = 1.0 / jnp.sqrt(dim)
    bound2 = 1.0 / jnp.sqrt(256.0)
    w1 = jax.random.uniform(k1, (dim, 256), jnp.float32, -bound1, bound1)
    b1 = jax.random.uniform(k2, (1, 256), jnp.float32, -bound1, bound1)
    w2 = jax.random.uniform(k3, (256, 1), jnp.float32, -bound2, bound2)
    b2 = jax.random.uniform(k4, (1, 1), jnp.float32, -bound2, bound2)
    return w1, b1, w2, b2


if __name__ == "__main__":
    key = jax.random.PRNGKey(0)
    f_dim = 16                          # -> self.dim = 2 * f_dim = 32
    B = 8

    kx, kp, kx2 = jax.random.split(key, 3)
    x = jax.random.normal(kx, (B, 2 * f_dim), dtype=jnp.float32)
    w1, b1, w2, b2 = init_params(kp, f_dim)

    # Pure-JAX reference (eval-mode dropout == identity).
    ref = jax.nn.sigmoid(jnp.maximum(x @ w1 + b1, 0.0) @ w2 + b2)

    # Default path: bf16 matmul inputs, f32 accumulation / epilogue.
    out = jax.block_until_ready(discriminator_forward(x, w1, b1, w2, b2))
    assert out.shape == (B, 1)
    assert jnp.allclose(out, ref, atol=3e-2, rtol=3e-2), "bf16 path mismatch"

    # Full-f32 path: tighter agreement (approx-reciprocal sigmoid is the only delta).
    out_f32 = jax.block_until_ready(
        discriminator_forward(x, w1, b1, w2, b2, compute_dtype=jnp.float32))
    assert jnp.allclose(out_f32, ref, atol=5e-3, rtol=5e-3), "f32 path mismatch"

    # Multi-tile grid with a ragged last batch tile (no wrapper-side pad copy).
    B2 = 200
    x2 = jax.random.normal(kx2, (B2, 2 * f_dim), dtype=jnp.float32)
    ref2 = jax.nn.sigmoid(jnp.maximum(x2 @ w1 + b1, 0.0) @ w2 + b2)
    out2 = jax.block_until_ready(discriminator_forward(x2, w1, b1, w2, b2))
    assert out2.shape == (B2, 1)
    assert jnp.allclose(out2, ref2, atol=3e-2, rtol=3e-2), "ragged multi-tile mismatch"

    print("KERNEL_OK")
</pallas_src>

<mosaic_0001>
module attributes {stable_mosaic.version = 11 : i64} {
  func.func @_disc_kernel(%arg0: i32, %arg1: memref<8x32xbf16, #tpu.memory_space<vmem>>, %arg2: memref<32x256xbf16, #tpu.memory_space<vmem>>, %arg3: memref<1x256xf32, #tpu.memory_space<vmem>>, %arg4: memref<8x256xf32, #tpu.memory_space<vmem>>, %arg5: memref<1x1xf32, #tpu.memory_space<smem>>, %arg6: memref<1x8xf32, #tpu.memory_space<vmem>>) attributes {dimension_semantics = [#tpu.dimension_semantics<parallel>], iteration_bounds = array<i64: 1>, scalar_prefetch = 0 : i64, scratch_operands = 0 : i64, tpu.core_type = #tpu.core_type<tc>, window_params = [{transform_indices = @transform_0, window_bounds = array<i64: 8, 32>}, {pipeline_mode = #tpu.pipeline_mode<synchronous>, transform_indices = @transform_1, window_bounds = array<i64: 32, 256>}, {pipeline_mode = #tpu.pipeline_mode<synchronous>, transform_indices = @transform_2, window_bounds = array<i64: 1, 256>}, {pipeline_mode = #tpu.pipeline_mode<synchronous>, transform_indices = @transform_3, window_bounds = array<i64: 8, 256>}, {transform_indices = @transform_4, window_bounds = array<i64: 1, 1>}, {transform_indices = @transform_5, window_bounds = array<i64: 1, 8>}]} {
    %c0 = arith.constant 0 : index
    %c0_0 = arith.constant 0 : index
    %0 = vector.load %arg1[%c0, %c0_0] : memref<8x32xbf16, #tpu.memory_space<vmem>>, vector<8x32xbf16>
    %c0_1 = arith.constant 0 : index
    %c0_2 = arith.constant 0 : index
    %1 = vector.load %arg2[%c0_1, %c0_2] : memref<32x256xbf16, #tpu.memory_space<vmem>>, vector<32x256xbf16>
    %cst = arith.constant dense<0.000000e+00> : vector<8x256xf32>
    %2 = tpu.matmul %0, %1, %cst {dimension_numbers = #tpu.dot_dimension_numbers<[1], [0], [0], [1], [0, 0, 1, 1], [], []>} : vector<8x32xbf16>, vector<32x256xbf16>, vector<8x256xf32> -> vector<8x256xf32>
    %c0_3 = arith.constant 0 : index
    %c0_4 = arith.constant 0 : index
    %3 = vector.load %arg3[%c0_3, %c0_4] : memref<1x256xf32, #tpu.memory_space<vmem>>, vector<1x256xf32>
    %4 = vector.broadcast %3 : vector<1x256xf32> to vector<8x256xf32>
    %5 = arith.addf %2, %4 : vector<8x256xf32>
    %cst_5 = arith.constant 0.000000e+00 : f32
    %6 = vector.broadcast %cst_5 : f32 to vector<8x256xf32>
    %7 = arith.maximumf %5, %6 : vector<8x256xf32>
    %c0_6 = arith.constant 0 : index
    %c0_7 = arith.constant 0 : index
    %8 = vector.load %arg4[%c0_6, %c0_7] : memref<8x256xf32, #tpu.memory_space<vmem>>, vector<8x256xf32>
    %cst_8 = arith.constant dense<0.000000e+00> : vector<8x8xf32>
    %9 = tpu.matmul %8, %7, %cst_8 {dimension_numbers = #tpu.dot_dimension_numbers<[1], [1], [0], [0], [0, 0, 1, 0], [], []>} : vector<8x256xf32>, vector<8x256xf32>, vector<8x8xf32> -> vector<8x8xf32>
    %10 = vector.extract_strided_slice %9 {offsets = [0, 0], sizes = [1, 8], strides = [1, 1]} : vector<8x8xf32> to vector<1x8xf32>
    %c0_9 = arith.constant 0 : index
    %c0_10 = arith.constant 0 : index
    %11 = memref.load %arg5[%c0_9, %c0_10] : memref<1x1xf32, #tpu.memory_space<smem>>
    %12 = vector.broadcast %11 : f32 to vector<1x8xf32>
    %13 = arith.addf %10, %12 : vector<1x8xf32>
    %cst_11 = arith.constant 0.000000e+00 : f32
    %14 = vector.broadcast %cst_11 : f32 to vector<1x8xf32>
    %15 = arith.subf %14, %13 : vector<1x8xf32>
    %16 = math.exp %15 : vector<1x8xf32>
    %cst_12 = arith.constant 1.000000e+00 : f32
    %17 = vector.broadcast %cst_12 : f32 to vector<1x8xf32>
    %18 = arith.addf %17, %16 : vector<1x8xf32>
    %19 = tpu.reciprocal %18 {approx = true} : vector<1x8xf32> -> vector<1x8xf32>
    %c0_13 = arith.constant 0 : index
    %c0_14 = arith.constant 0 : index
    %20 = vector.load %arg6[%c0_13, %c0_14] : memref<1x8xf32, #tpu.memory_space<vmem>>, vector<1x8xf32>
    tpu.vector_store %arg6[%c0_13, %c0_14], %19 {strides = array<i32>} : memref<1x8xf32, #tpu.memory_space<vmem>>, vector<1x8xf32>,
    return
  }
  func.func @transform_0(%arg0: i32) -> (i32, i32) {
    %c0_i32 = arith.constant 0 : i32
    %c0_i32_0 = arith.constant 0 : i32
    return %arg0, %c0_i32 : i32, i32
  }
  func.func @transform_1(%arg0: i32) -> (i32, i32) {
    %c0_i32 = arith.constant 0 : i32
    %c0_i32_0 = arith.constant 0 : i32
    %c0_i32_1 = arith.constant 0 : i32
    return %c0_i32, %c0_i32_0 : i32, i32
  }
  func.func @transform_2(%arg0: i32) -> (i32, i32) {
    %c0_i32 = arith.constant 0 : i32
    %c0_i32_0 = arith.constant 0 : i32
    %c0_i32_1 = arith.constant 0 : i32
    return %c0_i32, %c0_i32_0 : i32, i32
  }
  func.func @transform_3(%arg0: i32) -> (i32, i32) {
    %c0_i32 = arith.constant 0 : i32
    %c0_i32_0 = arith.constant 0 : i32
    %c0_i32_1 = arith.constant 0 : i32
    return %c0_i32, %c0_i32_0 : i32, i32
  }
  func.func @transform_4(%arg0: i32) -> (i32, i32) {
    %c0_i32 = arith.constant 0 : i32
    %c0_i32_0 = arith.constant 0 : i32
    %c0_i32_1 = arith.constant 0 : i32
    return %c0_i32, %c0_i32_0 : i32, i32
  }
  func.func @transform_5(%arg0: i32) -> (i32, i32) {
    %c0_i32 = arith.constant 0 : i32
    %c0_i32_0 = arith.constant 0 : i32
    return %c0_i32, %arg0 : i32, i32
  }
}

module attributes {stable_mosaic.version = 11 : i64} {
  func.func @_disc_kernel(%arg0: i32, %arg1: memref<8x32xbf16, #tpu.memory_space<vmem>>, %arg2: memref<32x256xbf16, #tpu.memory_space<vmem>>, %arg3: memref<1x256xf32, #tpu.memory_space<vmem>>, %arg4: memref<8x256xf32, #tpu.memory_space<vmem>>, %arg5: memref<1x1xf32, #tpu.memory_space<smem>>, %arg6: memref<1x8xf32, #tpu.memory_space<vmem>>) attributes {dimension_semantics = [#tpu.dimension_semantics<parallel>], iteration_bounds = array<i64: 1>, scalar_prefetch = 0 : i64, scratch_operands = 0 : i64, tpu.core_type = #tpu.core_type<tc>, window_params = [{transform_indices = @transform_0, window_bounds = array<i64: 8, 32>}, {pipeline_mode = #tpu.pipeline_mode<synchronous>, transform_indices = @transform_1, window_bounds = array<i64: 32, 256>}, {pipeline_mode = #tpu.pipeline_mode<synchronous>, transform_indices = @transform_2, window_bounds = array<i64: 1, 256>}, {pipeline_mode = #tpu.pipeline_mode<synchronous>, transform_indices = @transform_3, window_bounds = array<i64: 8, 256>}, {transform_indices = @transform_4, window_bounds = array<i64: 1, 1>}, {transform_indices = @transform_5, window_bounds = array<i64: 1, 8>}]} {
    %c0 = arith.constant 0 : index
    %c0_0 = arith.constant 0 : index
    %0 = vector.load %arg1[%c0, %c0_0] : memref<8x32xbf16, #tpu.memory_space<vmem>>, vector<8x32xbf16>
    %c0_1 = arith.constant 0 : index
    %c0_2 = arith.constant 0 : index
    %1 = vector.load %arg2[%c0_1, %c0_2] : memref<32x256xbf16, #tpu.memory_space<vmem>>, vector<32x256xbf16>
    %cst = arith.constant dense<0.000000e+00> : vector<8x256xf32>
    %2 = tpu.matmul %0, %1, %cst {dimension_numbers = #tpu.dot_dimension_numbers<[1], [0], [0], [1], [0, 0, 1, 1], [], []>} : vector<8x32xbf16>, vector<32x256xbf16>, vector<8x256xf32> -> vector<8x256xf32>
    %c0_3 = arith.constant 0 : index
    %c0_4 = arith.constant 0 : index
    %3 = vector.load %arg3[%c0_3, %c0_4] : memref<1x256xf32, #tpu.memory_space<vmem>>, vector<1x256xf32>
    %4 = vector.broadcast %3 : vector<1x256xf32> to vector<8x256xf32>
    %5 = arith.addf %2, %4 : vector<8x256xf32>
    %cst_5 = arith.constant 0.000000e+00 : f32
    %6 = vector.broadcast %cst_5 : f32 to vector<8x256xf32>
    %7 = arith.maximumf %5, %6 : vector<8x256xf32>
    %c0_6 = arith.constant 0 : index
    %c0_7 = arith.constant 0 : index
    %8 = vector.load %arg4[%c0_6, %c0_7] : memref<8x256xf32, #tpu.memory_space<vmem>>, vector<8x256xf32>
    %cst_8 = arith.constant dense<0.000000e+00> : vector<8x8xf32>
    %9 = tpu.matmul %8, %7, %cst_8 {dimension_numbers = #tpu.dot_dimension_numbers<[1], [1], [0], [0], [0, 0, 1, 0], [], []>} : vector<8x256xf32>, vector<8x256xf32>, vector<8x8xf32> -> vector<8x8xf32>
    %10 = vector.extract_strided_slice %9 {offsets = [0, 0], sizes = [1, 8], strides = [1, 1]} : vector<8x8xf32> to vector<1x8xf32>
    %c0_9 = arith.constant 0 : index
    %c0_10 = arith.constant 0 : index
    %11 = memref.load %arg5[%c0_9, %c0_10] : memref<1x1xf32, #tpu.memory_space<smem>>
    %12 = vector.broadcast %11 : f32 to vector<1x8xf32>
    %13 = arith.addf %10, %12 : vector<1x8xf32>
    %cst_11 = arith.constant 0.000000e+00 : f32
    %14 = vector.broadcast %cst_11 : f32 to vector<1x8xf32>
    %15 = arith.subf %14, %13 : vector<1x8xf32>
    %16 = math.exp %15 : vector<1x8xf32>
    %cst_12 = arith.constant 1.000000e+00 : f32
    %17 = vector.broadcast %cst_12 : f32 to vector<1x8xf32>
    %18 = arith.addf %17, %16 : vector<1x8xf32>
    %19 = tpu.reciprocal %18 {approx = true} : vector<1x8xf32> -> vector<1x8xf32>
    %c0_13 = arith.constant 0 : index
    %c0_14 = arith.constant 0 : index
    %20 = vector.load %arg6[%c0_13, %c0_14] : memref<1x8xf32, #tpu.memory_space<vmem>>, vector<1x8xf32>
    tpu.vector_store %arg6[%c0_13, %c0_14], %19 {strides = array<i32>} : memref<1x8xf32, #tpu.memory_space<vmem>>, vector<1x8xf32>,
    return
  }
  func.func @transform_0(%arg0: i32) -> (i32, i32) {
    %c0_i32 = arith.constant 0 : i32
    %c0_i32_0 = arith.constant 0 : i32
    return %arg0, %c0_i32 : i32, i32
  }
  func.func @transform_1(%arg0: i32) -> (i32, i32) {
    %c0_i32 = arith.constant 0 : i32
    %c0_i32_0 = arith.constant 0 : i32
    %c0_i32_1 = arith.constant 0 : i32
    return %c0_i32, %c0_i32_0 : i32, i32
  }
  func.func @transform_2(%arg0: i32) -> (i32, i32) {
    %c0_i32 = arith.constant 0 : i32
    %c0_i32_0 = arith.constant 0 : i32
    %c0_i32_1 = arith.constant 0 : i32
    return %c0_i32, %c0_i32_0 : i32, i32
  }
  func.func @transform_3(%arg0: i32) -> (i32, i32) {
    %c0_i32 = arith.constant 0 : i32
    %c0_i32_0 = arith.constant 0 : i32
    %c0_i32_1 = arith.constant 0 : i32
    return %c0_i32, %c0_i32_0 : i32, i32
  }
  func.func @transform_4(%arg0: i32) -> (i32, i32) {
    %c0_i32 = arith.constant 0 : i32
    %c0_i32_0 = arith.constant 0 : i32
    %c0_i32_1 = arith.constant 0 : i32
    return %c0_i32, %c0_i32_0 : i32, i32
  }
  func.func @transform_5(%arg0: i32) -> (i32, i32) {
    %c0_i32 = arith.constant 0 : i32
    %c0_i32_0 = arith.constant 0 : i32
    return %c0_i32, %arg0 : i32, i32
  }
}

</mosaic_0001>

<bundles_post_ra>
// kernel: tpu_custom_call.1
= control target key start
LH: loop header
LB: loop body
LE: loop exit
PB: predicated region body
PF: predicated region fallthrough
CT: control target
= control target key end

     0   :  { %11 = vsyncpa [#allocation4], 0  ;;  %s449_s0 = inlined_call_operand.hbm [shape: bf16[8,32], index: 0, kind: input, shape index: {}]   ;;  %s450_s1 = inlined_call_operand.hbm [shape: bf16[32,256], index: 1, kind: input, shape index: {}]   ;;  %s451_s2 = inlined_call_operand.vmem [shape: f32[1,256], index: 2, kind: input, shape index: {}]   ;;  %s452_s3 = inlined_call_operand.hbm [shape: f32[8,256], index: 3, kind: input, shape index: {}]   ;;  %s453_s4 = inlined_call_operand.<no memory space> [shape: f32[1,1], index: 4, kind: input, shape index: {}]   ;;  %s454_s5 = inlined_call_operand.hbm [shape: f32[1,8], index: 5, kind: output, shape index: {}]  }
   0x1   :  { %12 = vsyncpa [#allocation7], 0 }
   0x2   :  { %13 = vsyncpa [#allocation5], 0  ;;  %s358_s18 = smov [#allocation6]   ;;  %s264_s22 = scalar_lea.hbm %s450_s1, 512 }
   0x3   :  { %s29_s19 = sshll.u32 %s358_s18, 4  ;;  %p265_p0 = scmp.ne.s32.totalorder %s450_s1, %s264_s22  ;;  %s30_s19 = int_to_ptr.vmem [resolvable:$true] %s29_s19 }
   0x4   :  { %p268_p1 = scmp.lt.u32.totalorder %s264_s22, %s450_s1 }
   0x6   :  { %p270_p2 = pnand %p268_p1, %p265_p0 }
   0x8   :  { %273 = shalt.err (!%p270_p2)
}
   0x9   :  { %s274_s27 = scalar_lea.vmem %s30_s19, 512  ;;  %p279_p4 = scmp.lt.s32.totalorder %s30_s19, %s30_s19 }
   0xa   :  { %p275_p3 = scmp.ne.s32.totalorder %s30_s19, %s274_s27  ;;  %p280_p5 = scmp.lt.s32.totalorder %s274_s27, %s274_s27 }
   0xc   :  { %p281_p6 = por %p280_p5, %p279_p4 }
   0xe   :  { %p282_p7 = pnand %p281_p6, %p275_p3 }
  0x10   :  { %285 = shalt.err (!%p282_p7)
}
  0x11   :  { %s359_s28 = smov 128   ;;  %s360_s29 = smov 8  }
  0x12   :  { %35 = dma.hbm_to_vmem [thread:$0]  %s450_s1, 512, %s30_s19, [#allocation7], %s359_s28, %s359_s28, %s360_s29  }
  0x13   :  { %s361_s7 = smov [#allocation3]   ;;  %s362_s9 = smov [#allocation8]  }
  0x14   :  { %s20_s8 = sshll.u32 %s361_s7, 4  ;;  %s44_s10 = sshll.u32 %s362_s9, 4  ;;  %s21_s8 = int_to_ptr.vmem [resolvable:$true] %s20_s8  ;;  %s45_s10 = int_to_ptr.vmem [resolvable:$true] %s44_s10 }
  0x15   :  { %s286_s13 = scalar_lea.hbm %s449_s0, 64 }
  0x16   :  { %p287_p8 = scmp.ne.s32.totalorder %s449_s0, %s286_s13  ;;  %p290_p9 = scmp.lt.u32.totalorder %s286_s13, %s449_s0 }
  0x18   :  { %p292_p10 = pnand %p290_p9, %p287_p8 }
  0x1a   :  { %295 = shalt.err (!%p292_p10)
}
  0x1b   :  { %s296_s1 = scalar_lea.vmem %s21_s8, 64  ;;  %p301_p12 = scmp.lt.s32.totalorder %s21_s8, %s21_s8 }
  0x1c   :  { %p297_p11 = scmp.ne.s32.totalorder %s21_s8, %s296_s1  ;;  %p302_p13 = scmp.lt.s32.totalorder %s296_s1, %s296_s1 }
  0x1e   :  { %p303_p0 = por %p302_p13, %p301_p12 }
  0x20   :  { %p304_p1 = pnand %p303_p0, %p297_p11 }
  0x22   :  { %307 = shalt.err (!%p304_p1)
}
  0x23   :  { %23 = dma.hbm_to_vmem [thread:$0]  %s449_s0, 64, %s21_s8, [#allocation4]  }
  0x24   :  { %s308_s22 = scalar_lea.hbm %s452_s3, 256 }
  0x25   :  { %p309_p2 = scmp.ne.s32.totalorder %s452_s3, %s308_s22  ;;  %p312_p3 = scmp.lt.u32.totalorder %s308_s22, %s452_s3 }
  0x27   :  { %p314_p4 = pnand %p312_p3, %p309_p2 }
  0x29   :  { %317 = shalt.err (!%p314_p4)
}
  0x2a   :  { %s318_s27 = scalar_lea.vmem %s45_s10, 256  ;;  %p323_p6 = scmp.lt.s32.totalorder %s45_s10, %s45_s10 }
  0x2b   :  { %p319_p5 = scmp.ne.s32.totalorder %s45_s10, %s318_s27  ;;  %p324_p7 = scmp.lt.s32.totalorder %s318_s27, %s318_s27 }
  0x2d   :  { %p325_p8 = por %p324_p7, %p323_p6 }
  0x2f   :  { %p326_p9 = pnand %p325_p8, %p319_p5 }
  0x31   :  { %329 = shalt.err (!%p326_p9)
}
  0x32   :  { %47 = dma.hbm_to_vmem [thread:$0]  %s452_s3, 256, %s45_s10, [#allocation7]  }
  0x33   :  { %352 = dma.done.wait [#allocation4], 64  }
  0x34   :  { %353 = vsyncadd [#allocation4], 4294967232 }
  0x35   :  { %354 = dma.done.wait [#allocation7], 768  }
  0x36   :  { %355 = vsyncadd [#allocation7], 4294966528  ;;  %v363_v0 = vmov 0   ;;  %v254_v1 = vld [vmem:[#allocation6 + $0x4] ss:$8 sps:$4 sm:$0xff]   ;;  %vm97_vm0 = vcmask 261120   ;;  %v67_v7 = vlaneseq  ;;  %v217_v23 = vstv %s453_s4 }
  0x37   :  { %133 = vmatprep.mubr.bf16.mxu0 %v363_v0  ;;  %v256_v2 = vld [vmem:[#allocation6] ss:$8 sps:$4 sm:$0xff]   ;;  %101 = vmatprep.subr.bf16.mxu0 %v254_v1  ;;  %v257_v3 = vld [vmem:[#allocation6 + $0x14] ss:$8 sps:$4 sm:$0xff]   ;;  %v259_v4 = vld [vmem:[#allocation6 + $0x10] ss:$8 sps:$4 sm:$0xff]  }
  0x38   :  { %102 = vmatpush1.bf16.msra.mxu0 %v256_v2  ;;  %v60_v5 = vld [vmem:[#allocation3] sm:$0xf]  ;;  %v145_v6 = vld [vmem:[#allocation8 + $0x8] sm:$0xff]  ;;  %v68_v8 = vshrl.u32 %v67_v7, 7  ;;  %v144_v22 = vld [vmem:[#allocation8] sm:$0xff]  ;;  %vm224_vm1 = vcmask 57344  }
  0x39   :  { %103 = vmatprep.subr.bf16.mxu0 %v257_v3  ;;  %210 = vmatprep.mubr.f32.mxu1 %v145_v6  ;;  %v65_v10 = vld [vmem:[%s451_s2] sm:$0x3]  ;;  %s364_s2 = smov [#allocation9]  }
  0x3a   :  { %v69_v9 = vsub.s32 0, %v68_v8  ;;  %v73_v11 = vsub.s32 1, %v68_v8  ;;  %s232_s7 = sshll.u32 %s364_s2, 4  ;;  %s233_s7 = int_to_ptr.vmem [resolvable:$true] %s232_s7 }
  0x3b   :  { %s330_s8 = scalar_lea.vmem %s233_s7, 16  ;;  %s334_s9 = scalar_lea.vmem %s233_s7, 32 }
  0x3c   :  { %104 = vmatpush1.bf16.msra.mxu0 %v259_v4  ;;  %v70_v12 = vrot.slane %v65_v10, %v69_v9  ;;  %v74_v13 = vrot.slane %v65_v10, %v73_v11  ;;  %p331_p10 = scmp.ne.s32.totalorder %s233_s7, %s330_s8  ;;  %p335_p11 = scmp.lt.s32.totalorder %s233_s7, %s233_s7 }
  0x3d   :  { %p336_p12 = scmp.lt.s32.totalorder %s334_s9, %s330_s8 }
  0x3f   :  { %246 = vmatmul.mubr.msk.bf16.vlgmr.msra.gmra.mrb[0].mxu0 %vm97_vm0, %v60_v5  ;;  %p337_p13 = por %p336_p12, %p335_p11 }
  0x41   :  { %p338_p0 = pnand %p337_p13, %p331_p10 }
 0x112   :  { %v135_v14 = vpop.f32.mrb[0].mxu0 }
 0x113   :  { %v136_v15 = vadd.f32 %v135_v14, %v70_v12  ;;  %v137_v16 = vpop.f32.mrb[1].mxu0 }
 0x114   :  { %v139_v17 = vpop.f32.mrb[2].mxu0  ;;  %v138_v18 = vadd.f32 %v137_v16, %v74_v13 }
 0x115   :  { %v140_v19 = vpop.f32.mrb[3].mxu0  ;;  %v142_v21 = vmax.f32 %v136_v15, 0.0 }
 0x116   :  { %v143_v20 = vmax.f32 %v138_v18, 0.0 }
 0x118   :  { %146 = vmatprep.subr.mxu1 %v143_v20 }
 0x119   :  { %147 = vmatpush1.xpose.msra.mxu1 %v142_v21 }
 0x11c   :  { %211 = vmatmul.mubr.f32.vlgmr.msra.gmra.mrb[0].mxu1 %v144_v22 }
 0x1ef   :  { %v212_v24 = vpop.f32.mrb[0].mxu1 }
 0x1f0   :  { %v218_v25 = vadd.f32 %v217_v23, %v212_v24  ;;  %v214_v26 = vpop.f32.mrb[1].mxu1 }
 0x1f2   :  { %v219_v27 = vsub.f32 0.0, %v218_v25 }
 0x1f4   :  { %v220_v28 = vmul.f32 1.442695, %v219_v27 }
 0x1f6   :  { %260 = vpow2.f32 %v220_v28 }
 0x200   :  { %v261_v29 = vpop.eup %260 }
 0x201   :  { %v222_v30 = vadd.f32 1.0, %v261_v29 }
 0x203   :  { %262 = vrcp.f32 %v222_v30 }
 0x20d   :  { %v263_v31 = vpop.eup %262 }
 0x20e   :  { %225 = vst.msk [vmem:[#allocation9] sm:$0x1] %vm224_vm1, %v263_v31 }
 0x20f   :  { %341 = shalt.err (!%p338_p0)
}
 0x210   :  { %s342_s11 = scalar_lea.hbm %s454_s5, 16 }
 0x211   :  { %p343_p1 = scmp.ne.s32.totalorder %s454_s5, %s342_s11  ;;  %p346_p2 = scmp.lt.u32.totalorder %s342_s11, %s454_s5 }
 0x213   :  { %p348_p3 = pnand %p346_p2, %p343_p1 }
 0x215   :  { %351 = shalt.err (!%p348_p3)
}
 0x216   :  { %235 = dma.vmem_to_hbm [thread:$0]  %s233_s7, 16, %s454_s5, [#allocation5]  }
 0x217   :  { %356 = dma.done.wait [#allocation5], 16  }
 0x218   :  { %357 = vsyncadd [#allocation5], 4294967280 }
 0x219   :  { %239 = vsyncpa [#allocation4], 1 }
 0x21a   :  { %240 = vsyncpa [#allocation7], 1 }
 0x21b   :  { %241 = vsyncpa [#allocation5], 1 }

// kernel: tpu_custom_call.1
= control target key start
LH: loop header
LB: loop body
LE: loop exit
PB: predicated region body
PF: predicated region fallthrough
CT: control target
= control target key end

     0   :  { %11 = vsyncpa [#allocation4], 0  ;;  %s449_s0 = inlined_call_operand.hbm [shape: bf16[8,32], index: 0, kind: input, shape index: {}]   ;;  %s450_s1 = inlined_call_operand.hbm [shape: bf16[32,256], index: 1, kind: input, shape index: {}]   ;;  %s451_s2 = inlined_call_operand.vmem [shape: f32[1,256], index: 2, kind: input, shape index: {}]   ;;  %s452_s3 = inlined_call_operand.hbm [shape: f32[8,256], index: 3, kind: input, shape index: {}]   ;;  %s453_s4 = inlined_call_operand.<no memory space> [shape: f32[1,1], index: 4, kind: input, shape index: {}]   ;;  %s454_s5 = inlined_call_operand.hbm [shape: f32[1,8], index: 5, kind: output, shape index: {}]  }
   0x1   :  { %12 = vsyncpa [#allocation7], 0 }
   0x2   :  { %13 = vsyncpa [#allocation5], 0  ;;  %s358_s18 = smov [#allocation6]   ;;  %s264_s22 = scalar_lea.hbm %s450_s1, 512 }
   0x3   :  { %s29_s19 = sshll.u32 %s358_s18, 4  ;;  %p265_p0 = scmp.ne.s32.totalorder %s450_s1, %s264_s22  ;;  %s30_s19 = int_to_ptr.vmem [resolvable:$true] %s29_s19 }
   0x4   :  { %p268_p1 = scmp.lt.u32.totalorder %s264_s22, %s450_s1 }
   0x6   :  { %p270_p2 = pnand %p268_p1, %p265_p0 }
   0x8   :  { %273 = shalt.err (!%p270_p2)
}
   0x9   :  { %s274_s27 = scalar_lea.vmem %s30_s19, 512  ;;  %p279_p4 = scmp.lt.s32.totalorder %s30_s19, %s30_s19 }
   0xa   :  { %p275_p3 = scmp.ne.s32.totalorder %s30_s19, %s274_s27  ;;  %p280_p5 = scmp.lt.s32.totalorder %s274_s27, %s274_s27 }
   0xc   :  { %p281_p6 = por %p280_p5, %p279_p4 }
   0xe   :  { %p282_p7 = pnand %p281_p6, %p275_p3 }
  0x10   :  { %285 = shalt.err (!%p282_p7)
}
  0x11   :  { %s359_s28 = smov 128   ;;  %s360_s29 = smov 8  }
  0x12   :  { %35 = dma.hbm_to_vmem [thread:$0]  %s450_s1, 512, %s30_s19, [#allocation7], %s359_s28, %s359_s28, %s360_s29  }
  0x13   :  { %s361_s7 = smov [#allocation3]   ;;  %s362_s9 = smov [#allocation8]  }
  0x14   :  { %s20_s8 = sshll.u32 %s361_s7, 4  ;;  %s44_s10 = sshll.u32 %s362_s9, 4  ;;  %s21_s8 = int_to_ptr.vmem [resolvable:$true] %s20_s8  ;;  %s45_s10 = int_to_ptr.vmem [resolvable:$true] %s44_s10 }
  0x15   :  { %s286_s13 = scalar_lea.hbm %s449_s0, 64 }
  0x16   :  { %p287_p8 = scmp.ne.s32.totalorder %s449_s0, %s286_s13  ;;  %p290_p9 = scmp.lt.u32.totalorder %s286_s13, %s449_s0 }
  0x18   :  { %p292_p10 = pnand %p290_p9, %p287_p8 }
  0x1a   :  { %295 = shalt.err (!%p292_p10)
}
  0x1b   :  { %s296_s1 = scalar_lea.vmem %s21_s8, 64  ;;  %p301_p12 = scmp.lt.s32.totalorder %s21_s8, %s21_s8 }
  0x1c   :  { %p297_p11 = scmp.ne.s32.totalorder %s21_s8, %s296_s1  ;;  %p302_p13 = scmp.lt.s32.totalorder %s296_s1, %s296_s1 }
  0x1e   :  { %p303_p0 = por %p302_p13, %p301_p12 }
  0x20   :  { %p304_p1 = pnand %p303_p0, %p297_p11 }
  0x22   :  { %307 = shalt.err (!%p304_p1)
}
  0x23   :  { %23 = dma.hbm_to_vmem [thread:$0]  %s449_s0, 64, %s21_s8, [#allocation4]  }
  0x24   :  { %s308_s22 = scalar_lea.hbm %s452_s3, 256 }
  0x25   :  { %p309_p2 = scmp.ne.s32.totalorder %s452_s3, %s308_s22  ;;  %p312_p3 = scmp.lt.u32.totalorder %s308_s22, %s452_s3 }
  0x27   :  { %p314_p4 = pnand %p312_p3, %p309_p2 }
  0x29   :  { %317 = shalt.err (!%p314_p4)
}
  0x2a   :  { %s318_s27 = scalar_lea.vmem %s45_s10, 256  ;;  %p323_p6 = scmp.lt.s32.totalorder %s45_s10, %s45_s10 }
  0x2b   :  { %p319_p5 = scmp.ne.s32.totalorder %s45_s10, %s318_s27  ;;  %p324_p7 = scmp.lt.s32.totalorder %s318_s27, %s318_s27 }
  0x2d   :  { %p325_p8 = por %p324_p7, %p323_p6 }
  0x2f   :  { %p326_p9 = pnand %p325_p8, %p319_p5 }
  0x31   :  { %329 = shalt.err (!%p326_p9)
}
  0x32   :  { %47 = dma.hbm_to_vmem [thread:$0]  %s452_s3, 256, %s45_s10, [#allocation7]  }
  0x33   :  { %352 = dma.done.wait [#allocation4], 64  }
  0x34   :  { %353 = vsyncadd [#allocation4], 4294967232 }
  0x35   :  { %354 = dma.done.wait [#allocation7], 768  }
  0x36   :  { %355 = vsyncadd [#allocation7], 4294966528  ;;  %v363_v0 = vmov 0   ;;  %v254_v1 = vld [vmem:[#allocation6 + $0x4] ss:$8 sps:$4 sm:$0xff]   ;;  %vm97_vm0 = vcmask 261120   ;;  %v67_v7 = vlaneseq  ;;  %v217_v23 = vstv %s453_s4 }
  0x37   :  { %133 = vmatprep.mubr.bf16.mxu0 %v363_v0  ;;  %v256_v2 = vld [vmem:[#allocation6] ss:$8 sps:$4 sm:$0xff]   ;;  %101 = vmatprep.subr.bf16.mxu0 %v254_v1  ;;  %v257_v3 = vld [vmem:[#allocation6 + $0x14] ss:$8 sps:$4 sm:$0xff]   ;;  %v259_v4 = vld [vmem:[#allocation6 + $0x10] ss:$8 sps:$4 sm:$0xff]  }
  0x38   :  { %102 = vmatpush1.bf16.msra.mxu0 %v256_v2  ;;  %v60_v5 = vld [vmem:[#allocation3] sm:$0xf]  ;;  %v145_v6 = vld [vmem:[#allocation8 + $0x8] sm:$0xff]  ;;  %v68_v8 = vshrl.u32 %v67_v7, 7  ;;  %v144_v22 = vld [vmem:[#allocation8] sm:$0xff]  ;;  %vm224_vm1 = vcmask 57344  }
  0x39   :  { %103 = vmatprep.subr.bf16.mxu0 %v257_v3  ;;  %210 = vmatprep.mubr.f32.mxu1 %v145_v6  ;;  %v65_v10 = vld [vmem:[%s451_s2] sm:$0x3]  ;;  %s364_s2 = smov [#allocation9]  }
  0x3a   :  { %v69_v9 = vsub.s32 0, %v68_v8  ;;  %v73_v11 = vsub.s32 1, %v68_v8  ;;  %s232_s7 = sshll.u32 %s364_s2, 4  ;;  %s233_s7 = int_to_ptr.vmem [resolvable:$true] %s232_s7 }
  0x3b   :  { %s330_s8 = scalar_lea.vmem %s233_s7, 16  ;;  %s334_s9 = scalar_lea.vmem %s233_s7, 32 }
  0x3c   :  { %104 = vmatpush1.bf16.msra.mxu0 %v259_v4  ;;  %v70_v12 = vrot.slane %v65_v10, %v69_v9  ;;  %v74_v13 = vrot.slane %v65_v10, %v73_v11  ;;  %p331_p10 = scmp.ne.s32.totalorder %s233_s7, %s330_s8  ;;  %p335_p11 = scmp.lt.s32.totalorder %s233_s7, %s233_s7 }
  0x3d   :  { %p336_p12 = scmp.lt.s32.totalorder %s334_s9, %s330_s8 }
  0x3f   :  { %246 = vmatmul.mubr.msk.bf16.vlgmr.msra.gmra.mrb[0].mxu0 %vm97_vm0, %v60_v5  ;;  %p337_p13 = por %p336_p12, %p335_p11 }
  0x41   :  { %p338_p0 = pnand %p337_p13, %p331_p10 }
 0x112   :  { %v135_v14 = vpop.f32.mrb[0].mxu0 }
 0x113   :  { %v136_v15 = vadd.f32 %v135_v14, %v70_v12  ;;  %v137_v16 = vpop.f32.mrb[1].mxu0 }
 0x114   :  { %v139_v17 = vpop.f32.mrb[2].mxu0  ;;  %v138_v18 = vadd.f32 %v137_v16, %v74_v13 }
 0x115   :  { %v140_v19 = vpop.f32.mrb[3].mxu0  ;;  %v142_v21 = vmax.f32 %v136_v15, 0.0 }
 0x116   :  { %v143_v20 = vmax.f32 %v138_v18, 0.0 }
 0x118   :  { %146 = vmatprep.subr.mxu1 %v143_v20 }
 0x119   :  { %147 = vmatpush1.xpose.msra.mxu1 %v142_v21 }
 0x11c   :  { %211 = vmatmul.mubr.f32.vlgmr.msra.gmra.mrb[0].mxu1 %v144_v22 }
 0x1ef   :  { %v212_v24 = vpop.f32.mrb[0].mxu1 }
 0x1f0   :  { %v218_v25 = vadd.f32 %v217_v23, %v212_v24  ;;  %v214_v26 = vpop.f32.mrb[1].mxu1 }
 0x1f2   :  { %v219_v27 = vsub.f32 0.0, %v218_v25 }
 0x1f4   :  { %v220_v28 = vmul.f32 1.442695, %v219_v27 }
 0x1f6   :  { %260 = vpow2.f32 %v220_v28 }
 0x200   :  { %v261_v29 = vpop.eup %260 }
 0x201   :  { %v222_v30 = vadd.f32 1.0, %v261_v29 }
 0x203   :  { %262 = vrcp.f32 %v222_v30 }
 0x20d   :  { %v263_v31 = vpop.eup %262 }
 0x20e   :  { %225 = vst.msk [vmem:[#allocation9] sm:$0x1] %vm224_vm1, %v263_v31 }
 0x20f   :  { %341 = shalt.err (!%p338_p0)
}
 0x210   :  { %s342_s11 = scalar_lea.hbm %s454_s5, 16 }
 0x211   :  { %p343_p1 = scmp.ne.s32.totalorder %s454_s5, %s342_s11  ;;  %p346_p2 = scmp.lt.u32.totalorder %s342_s11, %s454_s5 }
 0x213   :  { %p348_p3 = pnand %p346_p2, %p343_p1 }
 0x215   :  { %351 = shalt.err (!%p348_p3)
}
 0x216   :  { %235 = dma.vmem_to_hbm [thread:$0]  %s233_s7, 16, %s454_s5, [#allocation5]  }
 0x217   :  { %356 = dma.done.wait [#allocation5], 16  }
 0x218   :  { %357 = vsyncadd [#allocation5], 4294967280 }
 0x219   :  { %239 = vsyncpa [#allocation4], 1 }
 0x21a   :  { %240 = vsyncpa [#allocation7], 1 }
 0x21b   :  { %241 = vsyncpa [#allocation5], 1 }

</bundles_post_ra>
